<compile_context>
chip_gen: v7x
topology: tpu7x:2x2x1
jax: 0.10.0
libtpu: 0.0.40
codegen_flags: <defaults>
</compile_context>

<pallas_src>
import functools

import jax
import jax.numpy as jnp
from jax import lax
from jax.experimental import pallas as pl
from jax.experimental.pallas import tpu as pltpu

_MIB = 1024 * 1024


def _vmem_limit(resident_bytes):
    """Pick a scoped-VMEM limit against the chip's physical VMEM capacity."""
    try:
        cap = pltpu.get_tpu_info().vmem_capacity_bytes
    except Exception:  # pragma: no cover - defensive (interpret mode etc.)
        cap = 64 * _MIB  # conservative: v7x per-TC physical VMEM
    want = max(32 * _MIB, 2 * int(resident_bytes))
    return int(min(want, (cap * 3) // 4))


# -----------------------------------------------------------------------------
# One-time parameter preparation (per model load, NOT per timestep).
# -----------------------------------------------------------------------------
def prepare_zoneout_lstm_params(w_ih, w_hh, b_ih, b_hh,
                                weight_dtype=jnp.bfloat16):
    """Pre-transpose / combine LSTMCell parameters.

    w_ih: (4H, I), w_hh: (4H, H), b_ih/b_hh: (4H,).
    Returns dict:
      w_ih_t : (I, 4H)   input weights (MXU-friendly layout)
      w_hh_t : (H, 4H)   recurrent weights (VMEM-resident in the seq kernel)
      bias   : (1, 4H)   b_ih + b_hh, kept f32 (added after f32 accumulation)
    Default weight_dtype is bf16 (MXU-native on v5e/v6e/v7x); accumulation is
    always f32 via preferred_element_type.
    """
    w_ih_t = jnp.asarray(w_ih.T, weight_dtype)
    w_hh_t = jnp.asarray(w_hh.T, weight_dtype)
    bias = (b_ih.astype(jnp.float32) + b_hh.astype(jnp.float32)).reshape(1, -1)
    return {"w_ih_t": w_ih_t, "w_hh_t": w_hh_t, "bias": bias}


def _lstm_gates(gates, c, H):
    """gates: (B, 4H) f32 pre-activations; c: (B, H) f32. Returns (h_new, c_new)."""
    i_g = jax.nn.sigmoid(gates[:, 0 * H:1 * H])
    f_g = jax.nn.sigmoid(gates[:, 1 * H:2 * H])
    g_g = jnp.tanh(gates[:, 2 * H:3 * H])
    o_g = jax.nn.sigmoid(gates[:, 3 * H:4 * H])
    c_new = f_g * c + i_g * g_g
    h_new = o_g * jnp.tanh(c_new)
    return h_new, c_new


# -----------------------------------------------------------------------------
# Single-step kernel: two MXU matmuls (no wrapper concat) + gates + zoneout mix.
# -----------------------------------------------------------------------------
def _zoneout_step_kernel(x_ref, h_ref, c_ref, wih_ref, whh_ref, b_ref,
                         h_out_ref, c_out_ref, *, hidden_size, zoneout_prob):
    H = hidden_size
    h = h_ref[...].astype(jnp.float32)
    c = c_ref[...].astype(jnp.float32)

    # Two MXU pushes with f32 accumulation; inputs cast to the weight dtype
    # (bf16 by default) only at the MXU boundary.
    gates = (jnp.dot(x_ref[...].astype(wih_ref.dtype), wih_ref[...],
                     preferred_element_type=jnp.float32)
             + jnp.dot(h_ref[...].astype(whh_ref.dtype), whh_ref[...],
                       preferred_element_type=jnp.float32)
             + b_ref[...])

    h_new, c_new = _lstm_gates(gates, c, H)

    p = jnp.float32(zoneout_prob)
    h_out_ref[...] = (p * h + (1.0 - p) * h_new).astype(h_out_ref.dtype)
    c_out_ref[...] = (p * c + (1.0 - p) * c_new).astype(c_out_ref.dtype)


def zoneout_lstm_cell(x, h, c, params, zoneout_prob=0.1):
    """Pallas ZoneOutCell(LSTMCell) single forward step.

    x: (B, I); h, c: (B, H); params from prepare_zoneout_lstm_params.
    Returns (h_next, c_next), each (B, H).
    """
    B = x.shape[0]
    H = h.shape[-1]
    I = x.shape[-1]
    w_ih_t = params["w_ih_t"]          # (I, 4H)
    w_hh_t = params["w_hh_t"]          # (H, 4H)
    b = params["bias"]                 # (1, 4H) f32

    kernel = functools.partial(_zoneout_step_kernel,
                               hidden_size=H, zoneout_prob=float(zoneout_prob))

    w_bytes = (w_ih_t.size * w_ih_t.dtype.itemsize
               + w_hh_t.size * w_hh_t.dtype.itemsize)
    bytes_accessed = (x.size * x.dtype.itemsize
                      + 2 * (h.size * h.dtype.itemsize)
                      + 2 * (c.size * c.dtype.itemsize)
                      + w_bytes + b.size * 4)
    cost = pl.CostEstimate(flops=2 * B * (I + H) * 4 * H,
                           transcendentals=5 * B * H,
                           bytes_accessed=int(bytes_accessed))

    vmem = pl.BlockSpec(memory_space=pltpu.MemorySpace.VMEM)
    h_next, c_next = pl.pallas_call(
        kernel,
        out_shape=(jax.ShapeDtypeStruct((B, H), h.dtype),
                   jax.ShapeDtypeStruct((B, H), c.dtype)),
        in_specs=[vmem] * 6,
        out_specs=(vmem, vmem),
        cost_estimate=cost,
        compiler_params=pltpu.CompilerParams(
            vmem_limit_bytes=_vmem_limit(bytes_accessed)),
    )(x, h, c, w_ih_t, w_hh_t, b)
    return h_next, c_next


# -----------------------------------------------------------------------------
# Whole-sequence kernel: grid=(T//Tc,), Tc timesteps per grid step,
# W_hh^T VMEM-resident, h/c carried in f32 scratch, c emitted once at the end.
# -----------------------------------------------------------------------------
def _zoneout_seq_kernel(xg_ref, h0_ref, c0_ref, whh_ref,
                        h_out_ref, c_last_ref, h_sc, c_sc,
                        *, hidden_size, zoneout_prob, chunk):
    t = pl.program_id(0)
    H = hidden_size
    p = jnp.float32(zoneout_prob)

    @pl.when(t == 0)
    def _():
        h_sc[...] = h0_ref[...].astype(jnp.float32)
        c_sc[...] = c0_ref[...].astype(jnp.float32)

    w = whh_ref[...]                                  # hoisted out of inner loop

    def body(tt, carry):
        h = h_sc[...]
        c = c_sc[...]
        # Only the recurrent matmul runs per step; the input projection (incl.
        # bias) was precomputed for all timesteps and streamed in as xg_ref.
        gates = xg_ref[tt].astype(jnp.float32) + jnp.dot(
            h.astype(w.dtype), w, preferred_element_type=jnp.float32)
        h_new, c_new = _lstm_gates(gates, c, H)
        h_mix = p * h + (1.0 - p) * h_new             # carried state is the
        c_mix = p * c + (1.0 - p) * c_new             # zoneout-mixed state
        h_sc[...] = h_mix
        c_sc[...] = c_mix
        h_out_ref[tt] = h_mix.astype(h_out_ref.dtype)
        return carry

    # Unrolled short fixed-trip-count loop: gives the LLO scheduler a whole
    # chunk's worth of MXU/EUP/VPU work to overlap.
    lax.fori_loop(0, chunk, body, 0, unroll=True)

    @pl.when(t == pl.num_programs(0) - 1)
    def _():
        c_last_ref[...] = c_sc[...].astype(c_last_ref.dtype)


def zoneout_lstm_sequence(x_seq, h0, c0, params, zoneout_prob=0.1, chunk=8):
    """Run ZoneOutCell(LSTMCell) over a whole sequence in one pallas_call.

    x_seq: (T, B, I); h0, c0: (B, H).
    Returns (h_seq, c_last): h_seq is (T, B, H), c_last is (B, H) (final cell
    state).  Final hidden state is h_seq[-1].
    """
    T, B, I = x_seq.shape
    H = h0.shape[-1]
    w_ih_t = params["w_ih_t"]          # (I, 4H)
    w_hh_t = params["w_hh_t"]          # (H, 4H)
    bias = params["bias"]              # (1, 4H) f32

    # Chunk size: largest divisor of T not exceeding the request.
    Tc = max(1, min(int(chunk), T))
    while T % Tc:
        Tc -= 1

    # Non-recurrent projection for ALL timesteps as one large matmul (M = T*B
    # keeps the MXU busy instead of M = B per step); bias folded in; streamed
    # into the kernel in the weight dtype (bf16 by default) to halve HBM bytes.
    xg_dtype = w_hh_t.dtype
    xg = (jnp.dot(x_seq.reshape(T * B, I).astype(w_ih_t.dtype), w_ih_t,
                  preferred_element_type=jnp.float32) + bias)
    xg = xg.reshape(T, B, 4 * H).astype(xg_dtype)

    kernel = functools.partial(_zoneout_seq_kernel, hidden_size=H,
                               zoneout_prob=float(zoneout_prob), chunk=Tc)

    xg_itm = jnp.dtype(xg_dtype).itemsize
    resident = (w_hh_t.size * w_hh_t.dtype.itemsize        # VMEM-resident W_hh^T
                + 2 * Tc * B * 4 * H * xg_itm              # double-buffered xg chunk
                + 2 * Tc * B * H * h0.dtype.itemsize       # double-buffered h_out chunk
                + 2 * B * H * 4                            # f32 h/c scratch
                + 3 * B * H * h0.dtype.itemsize)           # h0/c0/c_last blocks

    cost = pl.CostEstimate(
        flops=2 * T * B * H * 4 * H,
        transcendentals=5 * T * B * H,
        bytes_accessed=int(xg.size * xg_itm
                           + w_hh_t.size * w_hh_t.dtype.itemsize
                           + 3 * B * H * 4
                           + T * B * H * h0.dtype.itemsize))

    grid_spec = pltpu.PrefetchScalarGridSpec(
        num_scalar_prefetch=0,
        grid=(T // Tc,),
        in_specs=[
            pl.BlockSpec((Tc, B, 4 * H), lambda t: (t, 0, 0)),  # xg chunk
            pl.BlockSpec((B, H), lambda t: (0, 0)),             # h0 (read at t==0)
            pl.BlockSpec((B, H), lambda t: (0, 0)),             # c0 (read at t==0)
            pl.BlockSpec((H, 4 * H), lambda t: (0, 0)),         # W_hh^T: VMEM-resident
        ],
        out_specs=(
            pl.BlockSpec((Tc, B, H), lambda t: (t, 0, 0)),      # h chunk per grid step
            pl.BlockSpec((B, H), lambda t: (0, 0)),             # final c, written once
        ),
        scratch_shapes=[pltpu.VMEM((B, H), jnp.float32),
                        pltpu.VMEM((B, H), jnp.float32)],
    )

    h_seq, c_last = pl.pallas_call(
        kernel,
        out_shape=(jax.ShapeDtypeStruct((T, B, H), h0.dtype),
                   jax.ShapeDtypeStruct((B, H), c0.dtype)),
        grid_spec=grid_spec,
        cost_estimate=cost,
        compiler_params=pltpu.CompilerParams(
            dimension_semantics=("arbitrary",),     # recurrence: strict time order
            vmem_limit_bytes=_vmem_limit(resident)),
    )(xg, h0, c0, w_hh_t)
    return h_seq, c_last


# -----------------------------------------------------------------------------
# Pure-JAX reference (eval-mode zoneout), high-precision matmuls.
# -----------------------------------------------------------------------------
def _reference_step(x, h, c, w_ih, w_hh, b_ih, b_hh, p):
    hp = jax.lax.Precision.HIGHEST
    gates = (jnp.dot(x, w_ih.T, precision=hp) + b_ih
             + jnp.dot(h, w_hh.T, precision=hp) + b_hh)
    H = h.shape[-1]
    i = jax.nn.sigmoid(gates[:, 0 * H:1 * H])
    f = jax.nn.sigmoid(gates[:, 1 * H:2 * H])
    g = jnp.tanh(gates[:, 2 * H:3 * H])
    o = jax.nn.sigmoid(gates[:, 3 * H:4 * H])
    c_new = f * c + i * g
    h_new = o * jnp.tanh(c_new)
    return p * h + (1 - p) * h_new, p * c + (1 - p) * c_new


if __name__ == "__main__":
    B, I, H, T = 8, 64, 128, 16     # batch, input size, hidden size, seq length
    p = 0.1                          # zoneout probability

    key = jax.random.PRNGKey(0)
    kx, kxs, kh, kc, k1, k2, k3, k4 = jax.random.split(key, 8)

    # torch.nn.LSTMCell-style uniform(-1/sqrt(H), 1/sqrt(H)) init.
    bound = 1.0 / (H ** 0.5)
    w_ih = jax.random.uniform(k1, (4 * H, I), jnp.float32, -bound, bound)
    w_hh = jax.random.uniform(k2, (4 * H, H), jnp.float32, -bound, bound)
    b_ih = jax.random.uniform(k3, (4 * H,), jnp.float32, -bound, bound)
    b_hh = jax.random.uniform(k4, (4 * H,), jnp.float32, -bound, bound)

    x = jax.random.normal(kx, (B, I), jnp.float32)
    x_seq = jax.random.normal(kxs, (T, B, I), jnp.float32)
    h0 = jax.random.normal(kh, (B, H), jnp.float32)
    c0 = jax.random.normal(kc, (B, H), jnp.float32)

    # Reference trajectory.
    h_ref1, c_ref1 = _reference_step(x, h0, c0, w_ih, w_hh, b_ih, b_hh, p)
    h_ref_seq, c_r, h_r = [], c0, h0
    for t in range(T):
        h_r, c_r = _reference_step(x_seq[t], h_r, c_r, w_ih, w_hh, b_ih, b_hh, p)
        h_ref_seq.append(h_r)
    h_ref_seq = jnp.stack(h_ref_seq)

    # --- single step, f32 weights (matches the module's forward exactly) ---
    params_f32 = prepare_zoneout_lstm_params(w_ih, w_hh, b_ih, b_hh, jnp.float32)
    h1, c1 = zoneout_lstm_cell(x, h0, c0, params_f32, p)
    jax.block_until_ready((h1, c1))
    assert jnp.allclose(h1, h_ref1, atol=1e-4, rtol=1e-4)
    assert jnp.allclose(c1, c_ref1, atol=1e-4, rtol=1e-4)

    # --- single step, bf16 weights (default: half weight bytes, f32 accum) ---
    params_bf16 = prepare_zoneout_lstm_params(w_ih, w_hh, b_ih, b_hh)
    h1b, c1b = zoneout_lstm_cell(x, h0, c0, params_bf16, p)
    jax.block_until_ready((h1b, c1b))
    assert jnp.allclose(h1b, h_ref1, atol=5e-2, rtol=5e-2)
    assert jnp.allclose(c1b, c_ref1, atol=5e-2, rtol=5e-2)

    # --- whole sequence, f32 path: chunked grid, W_hh^T resident in VMEM ---
    h_seq, c_last = zoneout_lstm_sequence(x_seq, h0, c0, params_f32, p, chunk=8)
    jax.block_until_ready((h_seq, c_last))
    assert jnp.allclose(h_seq, h_ref_seq, atol=1e-4, rtol=1e-4)
    assert jnp.allclose(c_last, c_r, atol=1e-4, rtol=1e-4)

    # --- whole sequence, bf16 default (weights + xg stream) --------------
    h_seq_b, c_last_b = zoneout_lstm_sequence(x_seq, h0, c0, params_bf16, p, chunk=8)
    jax.block_until_ready((h_seq_b, c_last_b))
    assert jnp.allclose(h_seq_b, h_ref_seq, atol=1e-1, rtol=1e-1)
    assert jnp.allclose(c_last_b, c_r, atol=1e-1, rtol=1e-1)

    print("KERNEL_OK")
</pallas_src>

<mosaic_0001>
module attributes {stable_mosaic.version = 11 : i64} {
  func.func @_zoneout_step_kernel(%arg0: memref<8x64xf32, #tpu.memory_space<vmem>>, %arg1: memref<8x128xf32, #tpu.memory_space<vmem>>, %arg2: memref<8x128xf32, #tpu.memory_space<vmem>>, %arg3: memref<64x512xf32, #tpu.memory_space<vmem>>, %arg4: memref<128x512xf32, #tpu.memory_space<vmem>>, %arg5: memref<1x512xf32, #tpu.memory_space<vmem>>, %arg6: memref<8x128xf32, #tpu.memory_space<vmem>>, %arg7: memref<8x128xf32, #tpu.memory_space<vmem>>) attributes {dimension_semantics = [], scalar_prefetch = 0 : i64, scratch_operands = 0 : i64, tpu.core_type = #tpu.core_type<tc>} {
    %c0 = arith.constant 0 : index
    %c0_0 = arith.constant 0 : index
    %0 = vector.load %arg1[%c0, %c0_0] : memref<8x128xf32, #tpu.memory_space<vmem>>, vector<8x128xf32>
    %c0_1 = arith.constant 0 : index
    %c0_2 = arith.constant 0 : index
    %1 = vector.load %arg2[%c0_1, %c0_2] : memref<8x128xf32, #tpu.memory_space<vmem>>, vector<8x128xf32>
    %c0_3 = arith.constant 0 : index
    %c0_4 = arith.constant 0 : index
    %2 = vector.load %arg0[%c0_3, %c0_4] : memref<8x64xf32, #tpu.memory_space<vmem>>, vector<8x64xf32>
    %c0_5 = arith.constant 0 : index
    %c0_6 = arith.constant 0 : index
    %3 = vector.load %arg3[%c0_5, %c0_6] : memref<64x512xf32, #tpu.memory_space<vmem>>, vector<64x512xf32>
    %cst = arith.constant dense<0.000000e+00> : vector<8x512xf32>
    %4 = tpu.matmul %2, %3, %cst {dimension_numbers = #tpu.dot_dimension_numbers<[1], [0], [0], [1], [0, 0, 1, 1], [], []>} : vector<8x64xf32>, vector<64x512xf32>, vector<8x512xf32> -> vector<8x512xf32>
    %c0_7 = arith.constant 0 : index
    %c0_8 = arith.constant 0 : index
    %5 = vector.load %arg1[%c0_7, %c0_8] : memref<8x128xf32, #tpu.memory_space<vmem>>, vector<8x128xf32>
    %c0_9 = arith.constant 0 : index
    %c0_10 = arith.constant 0 : index
    %6 = vector.load %arg4[%c0_9, %c0_10] : memref<128x512xf32, #tpu.memory_space<vmem>>, vector<128x512xf32>
    %cst_11 = arith.constant dense<0.000000e+00> : vector<8x512xf32>
    %7 = tpu.matmul %5, %6, %cst_11 {dimension_numbers = #tpu.dot_dimension_numbers<[1], [0], [0], [1], [0, 0, 1, 1], [], []>} : vector<8x128xf32>, vector<128x512xf32>, vector<8x512xf32> -> vector<8x512xf32>
    %8 = arith.addf %4, %7 : vector<8x512xf32>
    %c0_12 = arith.constant 0 : index
    %c0_13 = arith.constant 0 : index
    %9 = vector.load %arg5[%c0_12, %c0_13] : memref<1x512xf32, #tpu.memory_space<vmem>>, vector<1x512xf32>
    %10 = vector.broadcast %9 : vector<1x512xf32> to vector<8x512xf32>
    %11 = arith.addf %8, %10 : vector<8x512xf32>
    %12 = vector.extract_strided_slice %11 {offsets = [0, 0], sizes = [8, 128], strides = [1, 1]} : vector<8x512xf32> to vector<8x128xf32>
    %13 = arith.negf %12 : vector<8x128xf32>
    %14 = math.exp %13 : vector<8x128xf32>
    %cst_14 = arith.constant 1.000000e+00 : f32
    %15 = vector.broadcast %cst_14 : f32 to vector<8x128xf32>
    %16 = arith.addf %15, %14 : vector<8x128xf32>
    %17 = arith.divf %15, %16 : vector<8x128xf32>
    %18 = vector.extract_strided_slice %11 {offsets = [0, 128], sizes = [8, 128], strides = [1, 1]} : vector<8x512xf32> to vector<8x128xf32>
    %19 = arith.negf %18 : vector<8x128xf32>
    %20 = math.exp %19 : vector<8x128xf32>
    %cst_15 = arith.constant 1.000000e+00 : f32
    %21 = vector.broadcast %cst_15 : f32 to vector<8x128xf32>
    %22 = arith.addf %21, %20 : vector<8x128xf32>
    %23 = arith.divf %21, %22 : vector<8x128xf32>
    %24 = vector.extract_strided_slice %11 {offsets = [0, 256], sizes = [8, 128], strides = [1, 1]} : vector<8x512xf32> to vector<8x128xf32>
    %25 = math.tanh %24 : vector<8x128xf32>
    %26 = vector.extract_strided_slice %11 {offsets = [0, 384], sizes = [8, 128], strides = [1, 1]} : vector<8x512xf32> to vector<8x128xf32>
    %27 = arith.negf %26 : vector<8x128xf32>
    %28 = math.exp %27 : vector<8x128xf32>
    %cst_16 = arith.constant 1.000000e+00 : f32
    %29 = vector.broadcast %cst_16 : f32 to vector<8x128xf32>
    %30 = arith.addf %29, %28 : vector<8x128xf32>
    %31 = arith.divf %29, %30 : vector<8x128xf32>
    %32 = arith.mulf %23, %1 : vector<8x128xf32>
    %33 = arith.mulf %17, %25 : vector<8x128xf32>
    %34 = arith.addf %32, %33 : vector<8x128xf32>
    %35 = math.tanh %34 : vector<8x128xf32>
    %36 = arith.mulf %31, %35 : vector<8x128xf32>
    %cst_17 = arith.constant 1.000000e-01 : f32
    %37 = vector.broadcast %cst_17 : f32 to vector<8x128xf32>
    %38 = arith.mulf %37, %0 : vector<8x128xf32>
    %cst_18 = arith.constant 1.000000e+00 : f32
    %cst_19 = arith.constant 1.000000e-01 : f32
    %39 = arith.subf %cst_18, %cst_19 : f32
    %40 = vector.broadcast %39 : f32 to vector<8x128xf32>
    %41 = arith.mulf %40, %36 : vector<8x128xf32>
    %42 = arith.addf %38, %41 : vector<8x128xf32>
    %c0_20 = arith.constant 0 : index
    %c0_21 = arith.constant 0 : index
    %43 = vector.load %arg6[%c0_20, %c0_21] : memref<8x128xf32, #tpu.memory_space<vmem>>, vector<8x128xf32>
    tpu.vector_store %arg6[%c0_20, %c0_21], %42 {strides = array<i32>} : memref<8x128xf32, #tpu.memory_space<vmem>>, vector<8x128xf32>,
    %cst_22 = arith.constant 1.000000e-01 : f32
    %44 = vector.broadcast %cst_22 : f32 to vector<8x128xf32>
    %45 = arith.mulf %44, %1 : vector<8x128xf32>
    %cst_23 = arith.constant 1.000000e+00 : f32
    %cst_24 = arith.constant 1.000000e-01 : f32
    %46 = arith.subf %cst_23, %cst_24 : f32
    %47 = vector.broadcast %46 : f32 to vector<8x128xf32>
    %48 = arith.mulf %47, %34 : vector<8x128xf32>
    %49 = arith.addf %45, %48 : vector<8x128xf32>
    %c0_25 = arith.constant 0 : index
    %c0_26 = arith.constant 0 : index
    %50 = vector.load %arg7[%c0_25, %c0_26] : memref<8x128xf32, #tpu.memory_space<vmem>>, vector<8x128xf32>
    tpu.vector_store %arg7[%c0_25, %c0_26], %49 {strides = array<i32>} : memref<8x128xf32, #tpu.memory_space<vmem>>, vector<8x128xf32>,
    return
  }
}

</mosaic_0001>

<bundles_post_ra>
// kernel: tpu_custom_call.1
= control target key start
LH: loop header
LB: loop body
LE: loop exit
PB: predicated region body
PF: predicated region fallthrough
CT: control target
= control target key end

     0   :  { %13 = vsyncpa [#allocation3], 0  ;;  %s1019_s0 = inlined_call_operand.hbm [shape: f32[8,64], index: 0, kind: input, shape index: {}]   ;;  %s1020_s1 = inlined_call_operand.hbm [shape: f32[8,128], index: 1, kind: input, shape index: {}]   ;;  %s1021_s2 = inlined_call_operand.hbm [shape: f32[8,128], index: 2, kind: input, shape index: {}]   ;;  %s1022_s3 = inlined_call_operand.hbm [shape: f32[64,512], index: 3, kind: input, shape index: {}]   ;;  %s1023_s4 = inlined_call_operand.hbm [shape: f32[128,512], index: 4, kind: input, shape index: {}]   ;;  %s1024_s5 = inlined_call_operand.vmem [shape: f32[1,512], index: 5, kind: input, shape index: {}]   ;;  %s1025_s6 = inlined_call_operand.hbm [shape: f32[8,128], index: 6, kind: output, shape index: {0}]   ;;  %s1026_s7 = inlined_call_operand.hbm [shape: f32[8,128], index: 7, kind: output, shape index: {1}]  }
   0x1   :  { %14 = vsyncpa [#allocation6], 0 }
   0x2   :  { %15 = vsyncpa [#allocation9], 0 }
   0x3   :  { %16 = vsyncpa [#allocation4], 0 }
   0x4   :  { %17 = vsyncpa [#allocation13], 0  ;;  %s860_s24 = smov [#allocation5]   ;;  %s861_s26 = smov [#allocation8]  }
   0x5   :  { %s34_s25 = sshll.u32 %s860_s24, 4  ;;  %s53_s27 = sshll.u32 %s861_s26, 4  ;;  %s35_s25 = int_to_ptr.vmem [resolvable:$true] %s34_s25  ;;  %s910_s27 = int_to_ptr.vmem [resolvable:$true] %s53_s27 }
   0x6   :  { %s696_s30 = scalar_lea.hbm %s1020_s1, 128 }
   0x7   :  { %p697_p0 = scmp.ne.s32.totalorder %s1020_s1, %s696_s30  ;;  %p700_p1 = scmp.lt.u32.totalorder %s696_s30, %s1020_s1 }
   0x9   :  { %p702_p2 = pnand %p700_p1, %p697_p0 }
   0xb   :  { %705 = shalt.err (!%p702_p2)
}
   0xc   :  { %s706_s12 = scalar_lea.vmem %s35_s25, 128  ;;  %p711_p4 = scmp.lt.s32.totalorder %s35_s25, %s35_s25 }
   0xd   :  { %p707_p3 = scmp.ne.s32.totalorder %s35_s25, %s706_s12  ;;  %p712_p5 = scmp.lt.s32.totalorder %s706_s12, %s706_s12 }
   0xf   :  { %p713_p6 = por %p712_p5, %p711_p4 }
  0x11   :  { %p714_p7 = pnand %p713_p6, %p707_p3 }
  0x13   :  { %717 = shalt.err (!%p714_p7)
}
  0x14   :  { %37 = dma.hbm_to_vmem [thread:$0]  %s1020_s1, 128, %s35_s25, [#allocation6]  }
  0x15   :  { %s718_s17 = scalar_lea.hbm %s1022_s3, 4096 }
  0x16   :  { %p719_p8 = scmp.ne.s32.totalorder %s1022_s3, %s718_s17  ;;  %p722_p9 = scmp.lt.u32.totalorder %s718_s17, %s1022_s3 }
  0x18   :  { %p724_p10 = pnand %p722_p9, %p719_p8 }
  0x1a   :  { %727 = shalt.err (!%p724_p10)
}
  0x1b   :  { %s728_s22 = scalar_lea.vmem %s910_s27, 4096  ;;  %p733_p12 = scmp.lt.s32.totalorder %s910_s27, %s910_s27 }
  0x1c   :  { %p729_p11 = scmp.ne.s32.totalorder %s910_s27, %s728_s22  ;;  %p734_p13 = scmp.lt.s32.totalorder %s728_s22, %s728_s22 }
  0x1e   :  { %p735_p0 = por %p734_p13, %p733_p12 }
  0x20   :  { %p736_p1 = pnand %p735_p0, %p729_p11 }
  0x22   :  { %739 = shalt.err (!%p736_p1)
}
  0x23   :  { %s862_s1 = smov 512   ;;  %s863_s23 = smov 32  }
  0x24   :  { %59 = dma.hbm_to_vmem [thread:$0]  %s1022_s3, 4096, %s910_s27, [#allocation9], %s862_s1, %s862_s1, %s863_s23  }
  0x25   :  { %s864_s26 = smov [#allocation2]   ;;  %s865_s29 = smov [#allocation7]  }
  0x26   :  { %s24_s28 = sshll.u32 %s864_s26, 4  ;;  %s44_s30 = sshll.u32 %s865_s29, 4  ;;  %s25_s28 = int_to_ptr.vmem [resolvable:$true] %s24_s28  ;;  %s45_s30 = int_to_ptr.vmem [resolvable:$true] %s44_s30 }
  0x27   :  { %s740_s10 = scalar_lea.hbm %s1019_s0, 128 }
  0x28   :  { %p741_p2 = scmp.ne.s32.totalorder %s1019_s0, %s740_s10  ;;  %p744_p3 = scmp.lt.u32.totalorder %s740_s10, %s1019_s0 }
  0x2a   :  { %p746_p4 = pnand %p744_p3, %p741_p2 }
  0x2c   :  { %749 = shalt.err (!%p746_p4)
}
  0x2d   :  { %s750_s3 = scalar_lea.vmem %s25_s28, 128  ;;  %p755_p6 = scmp.lt.s32.totalorder %s25_s28, %s25_s28 }
  0x2e   :  { %p751_p5 = scmp.ne.s32.totalorder %s25_s28, %s750_s3  ;;  %p756_p7 = scmp.lt.s32.totalorder %s750_s3, %s750_s3 }
  0x30   :  { %p757_p8 = por %p756_p7, %p755_p6 }
  0x32   :  { %p758_p9 = pnand %p757_p8, %p751_p5 }
  0x34   :  { %761 = shalt.err (!%p758_p9)
}
  0x35   :  { %27 = dma.hbm_to_vmem [thread:$0]  %s1019_s0, 128, %s25_s28, [#allocation3]  }
  0x36   :  { %s762_s18 = scalar_lea.hbm %s1021_s2, 128 }
  0x37   :  { %p763_p10 = scmp.ne.s32.totalorder %s1021_s2, %s762_s18  ;;  %p766_p11 = scmp.lt.u32.totalorder %s762_s18, %s1021_s2 }
  0x39   :  { %p768_p12 = pnand %p766_p11, %p763_p10 }
  0x3b   :  { %771 = shalt.err (!%p768_p12)
}
  0x3c   :  { %s772_s24 = scalar_lea.vmem %s45_s30, 128  ;;  %p777_p0 = scmp.lt.s32.totalorder %s45_s30, %s45_s30 }
  0x3d   :  { %p773_p13 = scmp.ne.s32.totalorder %s45_s30, %s772_s24  ;;  %p778_p1 = scmp.lt.s32.totalorder %s772_s24, %s772_s24 }
  0x3f   :  { %p779_p2 = por %p778_p1, %p777_p0 }
  0x41   :  { %p780_p3 = pnand %p779_p2, %p773_p13 }
  0x43   :  { %783 = shalt.err (!%p780_p3)
}
  0x44   :  { %47 = dma.hbm_to_vmem [thread:$0]  %s1021_s2, 128, %s45_s30, [#allocation6]  }
  0x45   :  { %s866_s26 = smov [#allocation10]   ;;  %s784_s9 = scalar_lea.hbm %s1023_s4, 8192 }
  0x46   :  { %s65_s28 = sshll.u32 %s866_s26, 4  ;;  %p785_p4 = scmp.ne.s32.totalorder %s1023_s4, %s784_s9  ;;  %s66_s28 = int_to_ptr.vmem [resolvable:$true] %s65_s28 }
  0x47   :  { %p788_p5 = scmp.lt.u32.totalorder %s784_s9, %s1023_s4 }
  0x49   :  { %p790_p6 = pnand %p788_p5, %p785_p4 }
  0x4b   :  { %793 = shalt.err (!%p790_p6)
}
  0x4c   :  { %s794_s14 = scalar_lea.vmem %s66_s28, 8192  ;;  %p799_p8 = scmp.lt.s32.totalorder %s66_s28, %s66_s28 }
  0x4d   :  { %p795_p7 = scmp.ne.s32.totalorder %s66_s28, %s794_s14  ;;  %p800_p9 = scmp.lt.s32.totalorder %s794_s14, %s794_s14 }
  0x4f   :  { %p801_p10 = por %p800_p9, %p799_p8 }
  0x51   :  { %p802_p11 = pnand %p801_p10, %p795_p7 }
  0x53   :  { %805 = shalt.err (!%p802_p11)
}
  0x54   :  { %71 = dma.hbm_to_vmem [thread:$0]  %s1023_s4, 8192, %s66_s28, [#allocation9], %s862_s1, %s862_s1, %s863_s23  }
  0x55   :  { %850 = dma.done.wait [#allocation3], 128  }
  0x56   :  { %851 = vsyncadd [#allocation3], 4294967168 }
  0x57   :  { %852 = dma.done.wait [#allocation6], 256  }
  0x58   :  { %853 = vsyncadd [#allocation6], 4294967040 }
  0x59   :  { %854 = dma.done.wait [#allocation9], 12288  }
  0x5a   :  { %855 = vsyncadd [#allocation9], 4294955008  ;;  %v867_v0 = vmov 0.0   ;;  %v125_v1 = vld [vmem:[#allocation10 + $0x8] sm:$0xff]  ;;  %v127_v3 = vld [vmem:[#allocation10 + $0x18] sm:$0xff]  ;;  %vm330_vm0 = vcmask 523264  }
  0x5b   :  { %252 = vmatprep.mubr.f32.mxu0 %v867_v0  ;;  %323 = vmatprep.mubr.f32.mxu1 %v867_v0  ;;  %v129_v2 = vld [vmem:[#allocation10 + $0x28] sm:$0xff]  ;;  %v131_v5 = vld [vmem:[#allocation10 + $0x38] sm:$0xff]  ;;  %v124_v6 = vld [vmem:[#allocation10] sm:$0xff] }
  0x5c   :  { %v570_v4 = vpack.c.bf16 %v129_v2, %v125_v1  ;;  %v128_v7 = vld [vmem:[#allocation10 + $0x20] sm:$0xff]  ;;  %v602_v8 = vpack.c.bf16 %v131_v5, %v127_v3  ;;  %v126_v10 = vld [vmem:[#allocation10 + $0x10] sm:$0xff]  ;;  %v133_v12 = vld [vmem:[#allocation10 + $0x48] sm:$0xff] }
  0x5d   :  { %v572_v9 = vpack.c.bf16 %v128_v7, %v124_v6  ;;  %v130_v11 = vld [vmem:[#allocation10 + $0x30] sm:$0xff]  ;;  %v137_v14 = vld [vmem:[#allocation10 + $0x68] sm:$0xff]  ;;  %v135_v15 = vld [vmem:[#allocation10 + $0x58] sm:$0xff] }
  0x5e   :  { %571 = vmatprep.subr.bf16.mxu0 %v570_v4  ;;  %v604_v13 = vpack.c.bf16 %v130_v11, %v126_v10  ;;  %v139_v16 = vld [vmem:[#allocation10 + $0x78] sm:$0xff]  ;;  %603 = vmatprep.subr.bf16.mxu1 %v602_v8  ;;  %v574_v17 = vpack.c.bf16 %v137_v14, %v133_v12  ;;  %v132_v19 = vld [vmem:[#allocation10 + $0x40] sm:$0xff]  ;;  %v134_v21 = vld [vmem:[#allocation10 + $0x50] sm:$0xff] }
  0x5f   :  { %573 = vmatpush1.bf16.msra.mxu0 %v572_v9  ;;  %v606_v18 = vpack.c.bf16 %v139_v16, %v135_v15  ;;  %v136_v20 = vld [vmem:[#allocation10 + $0x60] sm:$0xff]  ;;  %v138_v23 = vld [vmem:[#allocation10 + $0x70] sm:$0xff]  ;;  %v141_v24 = vld [vmem:[#allocation10 + $0x88] sm:$0xff] }
  0x60   :  { %605 = vmatpush1.bf16.msra.mxu1 %v604_v13  ;;  %v576_v22 = vpack.c.bf16 %v136_v20, %v132_v19  ;;  %v145_v25 = vld [vmem:[#allocation10 + $0xa8] sm:$0xff]  ;;  %575 = vmatprep.subr.bf16.mxu0 %v574_v17  ;;  %v608_v26 = vpack.c.bf16 %v138_v23, %v134_v21  ;;  %v143_v28 = vld [vmem:[#allocation10 + $0x98] sm:$0xff]  ;;  %v140_v30 = vld [vmem:[#allocation10 + $0x80] sm:$0xff] }
  0x61   :  { %607 = vmatprep.subr.bf16.mxu1 %v606_v18  ;;  %v578_v27 = vpack.c.bf16 %v145_v25, %v141_v24  ;;  %v147_v29 = vld [vmem:[#allocation10 + $0xb8] sm:$0xff]  ;;  %v144_v32 = vld [vmem:[#allocation10 + $0xa0] sm:$0xff]  ;;  %v142_v33 = vld [vmem:[#allocation10 + $0x90] sm:$0xff] }
  0x62   :  { %v610_v31 = vpack.c.bf16 %v147_v29, %v143_v28  ;;  %v146_v34 = vld [vmem:[#allocation10 + $0xb0] sm:$0xff]  ;;  %v580_v35 = vpack.c.bf16 %v144_v32, %v140_v30  ;;  %v149_v36 = vld [vmem:[#allocation10 + $0xc8] sm:$0xff]  ;;  %v151_v38 = vld [vmem:[#allocation10 + $0xd8] sm:$0xff] }
  0x63   :  { %577 = vmatpush1.bf16.msra.mxu0 %v576_v22  ;;  %v153_v37 = vld [vmem:[#allocation10 + $0xe8] sm:$0xff]  ;;  %v612_v39 = vpack.c.bf16 %v146_v34, %v142_v33  ;;  %v155_v41 = vld [vmem:[#allocation10 + $0xf8] sm:$0xff]  ;;  %v148_v42 = vld [vmem:[#allocation10 + $0xc0] sm:$0xff] }
  0x64   :  { %609 = vmatpush1.bf16.msra.mxu1 %v608_v26  ;;  %579 = vmatprep.subr.bf16.mxu0 %v578_v27  ;;  %v582_v40 = vpack.c.bf16 %v153_v37, %v149_v36  ;;  %v152_v43 = vld [vmem:[#allocation10 + $0xe0] sm:$0xff]  ;;  %v614_v44 = vpack.c.bf16 %v155_v41, %v151_v38  ;;  %v150_v45 = vld [vmem:[#allocation10 + $0xd0] sm:$0xff]  ;;  %v157_v47 = vld [vmem:[#allocation10 + $0x108] sm:$0xff] }
  0x65   :  { %611 = vmatprep.subr.bf16.mxu1 %v610_v31  ;;  %v154_v46 = vld [vmem:[#allocation10 + $0xf0] sm:$0xff]  ;;  %v161_v48 = vld [vmem:[#allocation10 + $0x128] sm:$0xff]  ;;  %v159_v49 = vld [vmem:[#allocation10 + $0x118] sm:$0xff]  ;;  %v584_v51 = vpack.c.bf16 %v152_v43, %v148_v42 }
  0x66   :  { %v163_v50 = vld [vmem:[#allocation10 + $0x138] sm:$0xff]  ;;  %v616_v52 = vpack.c.bf16 %v154_v46, %v150_v45  ;;  %v586_v53 = vpack.c.bf16 %v161_v48, %v157_v47  ;;  %v156_v54 = vld [vmem:[#allocation10 + $0x100] sm:$0xff]  ;;  %v158_v56 = vld [vmem:[#allocation10 + $0x110] sm:$0xff] }
  0x67   :  { %581 = vmatpush1.bf16.msra.mxu0 %v580_v35  ;;  %v160_v55 = vld [vmem:[#allocation10 + $0x120] sm:$0xff]  ;;  %v618_v57 = vpack.c.bf16 %v163_v50, %v159_v49  ;;  %v162_v58 = vld [vmem:[#allocation10 + $0x130] sm:$0xff]  ;;  %v165_v59 = vld [vmem:[#allocation10 + $0x148] sm:$0xff] }
  0x68   :  { %613 = vmatpush1.bf16.msra.mxu1 %v612_v39  ;;  %583 = vmatprep.subr.bf16.mxu0 %v582_v40  ;;  %v169_v60 = vld [vmem:[#allocation10 + $0x168] sm:$0xff]  ;;  %v167_v61 = vld [vmem:[#allocation10 + $0x158] sm:$0xff]  ;;  %v588_v63 = vpack.c.bf16 %v160_v55, %v156_v54  ;;  %v620_v1 = vpack.c.bf16 %v162_v58, %v158_v56  ;;  %v164_v3 = vld [vmem:[#allocation10 + $0x140] sm:$0xff] }
  0x69   :  { %615 = vmatprep.subr.bf16.mxu1 %v614_v44  ;;  %v171_v62 = vld [vmem:[#allocation10 + $0x178] sm:$0xff]  ;;  %v590_v2 = vpack.c.bf16 %v169_v60, %v165_v59  ;;  %v168_v4 = vld [vmem:[#allocation10 + $0x160] sm:$0xff]  ;;  %v166_v5 = vld [vmem:[#allocation10 + $0x150] sm:$0xff] }
  0x6a   :  { %v622_v6 = vpack.c.bf16 %v171_v62, %v167_v61  ;;  %v170_v7 = vld [vmem:[#allocation10 + $0x170] sm:$0xff]  ;;  %v173_v8 = vld [vmem:[#allocation10 + $0x188] sm:$0xff]  ;;  %v175_v10 = vld [vmem:[#allocation10 + $0x198] sm:$0xff]  ;;  %v592_v12 = vpack.c.bf16 %v168_v4, %v164_v3 }
  0x6b   :  { %585 = vmatpush1.bf16.msra.mxu0 %v584_v51  ;;  %v177_v9 = vld [vmem:[#allocation10 + $0x1a8] sm:$0xff]  ;;  %v179_v11 = vld [vmem:[#allocation10 + $0x1b8] sm:$0xff]  ;;  %v624_v13 = vpack.c.bf16 %v170_v7, %v166_v5  ;;  %v172_v15 = vld [vmem:[#allocation10 + $0x180] sm:$0xff] }
  0x6c   :  { %617 = vmatpush1.bf16.msra.mxu1 %v616_v52  ;;  %587 = vmatprep.subr.bf16.mxu0 %v586_v53  ;;  %v594_v14 = vpack.c.bf16 %v177_v9, %v173_v8  ;;  %v176_v16 = vld [vmem:[#allocation10 + $0x1a0] sm:$0xff]  ;;  %v174_v17 = vld [vmem:[#allocation10 + $0x190] sm:$0xff]  ;;  %v626_v18 = vpack.c.bf16 %v179_v11, %v175_v10  ;;  %v181_v20 = vld [vmem:[#allocation10 + $0x1c8] sm:$0xff] }
  0x6d   :  { %619 = vmatprep.subr.bf16.mxu1 %v618_v57  ;;  %v178_v19 = vld [vmem:[#allocation10 + $0x1b0] sm:$0xff]  ;;  %v185_v21 = vld [vmem:[#allocation10 + $0x1e8] sm:$0xff]  ;;  %v183_v22 = vld [vmem:[#allocation10 + $0x1d8] sm:$0xff]  ;;  %v596_v24 = vpack.c.bf16 %v176_v16, %v172_v15 }
  0x6e   :  { %v187_v23 = vld [vmem:[#allocation10 + $0x1f8] sm:$0xff]  ;;  %v628_v25 = vpack.c.bf16 %v178_v19, %v174_v17  ;;  %v598_v26 = vpack.c.bf16 %v185_v21, %v181_v20  ;;  %v180_v27 = vld [vmem:[#allocation10 + $0x1c0] sm:$0xff]  ;;  %v182_v29 = vld [vmem:[#allocation10 + $0x1d0] sm:$0xff]  ;;  %v478_v20 = vlaneseq }
  0x6f   :  { %589 = vmatpush1.bf16.msra.mxu0 %v588_v63  ;;  %v184_v28 = vld [vmem:[#allocation10 + $0x1e0] sm:$0xff]  ;;  %v630_v30 = vpack.c.bf16 %v187_v23, %v183_v22  ;;  %v186_v31 = vld [vmem:[#allocation10 + $0x1f0] sm:$0xff]  ;;  %v93_v32 = vld [vmem:[#allocation8 + $0x8] sm:$0xff] }
  0x70   :  { %621 = vmatpush1.bf16.msra.mxu1 %v620_v1  ;;  %591 = vmatprep.subr.bf16.mxu0 %v590_v2  ;;  %v97_v33 = vld [vmem:[#allocation8 + $0x28] sm:$0xff]  ;;  %v95_v34 = vld [vmem:[#allocation8 + $0x18] sm:$0xff]  ;;  %v600_v36 = vpack.c.bf16 %v184_v28, %v180_v27  ;;  %v632_v37 = vpack.c.bf16 %v186_v31, %v182_v29  ;;  %v92_v39 = vld [vmem:[#allocation8] sm:$0xff]  ;;  %v479_v21 = vshrl.u32 %v478_v20, 7 }
  0x71   :  { %623 = vmatprep.subr.bf16.mxu1 %v622_v6  ;;  %v99_v35 = vld [vmem:[#allocation8 + $0x38] sm:$0xff]  ;;  %v634_v38 = vpack.c.bf16 %v97_v33, %v93_v32  ;;  %v96_v40 = vld [vmem:[#allocation8 + $0x20] sm:$0xff]  ;;  %v94_v41 = vld [vmem:[#allocation8 + $0x10] sm:$0xff] }
  0x72   :  { %v650_v42 = vpack.c.bf16 %v99_v35, %v95_v34  ;;  %v98_v43 = vld [vmem:[#allocation8 + $0x30] sm:$0xff]  ;;  %v101_v44 = vld [vmem:[#allocation8 + $0x48] sm:$0xff]  ;;  %v103_v46 = vld [vmem:[#allocation8 + $0x58] sm:$0xff]  ;;  %v636_v49 = vpack.c.bf16 %v96_v40, %v92_v39  ;;  %v480_v22 = vsub.s32 0, %v479_v21  ;;  %v492_v28 = vsub.s32 3, %v479_v21 }
  0x73   :  { %593 = vmatpush1.bf16.msra.mxu0 %v592_v12  ;;  %v105_v45 = vld [vmem:[#allocation8 + $0x68] sm:$0xff]  ;;  %v107_v47 = vld [vmem:[#allocation8 + $0x78] sm:$0xff]  ;;  %v985_v48 = vld [vmem:[#allocation5] sm:$0xff]  ;;  %v652_v50 = vpack.c.bf16 %v98_v43, %v94_v41 }
  0x74   :  { %625 = vmatpush1.bf16.msra.mxu1 %v624_v13  ;;  %595 = vmatprep.subr.bf16.mxu0 %v594_v14  ;;  %v638_v51 = vpack.c.bf16 %v105_v45, %v101_v44  ;;  %v100_v52 = vld [vmem:[#allocation8 + $0x40] sm:$0xff]  ;;  %v102_v54 = vld [vmem:[#allocation8 + $0x50] sm:$0xff]  ;;  %v654_v55 = vpack.c.bf16 %v107_v47, %v103_v46  ;;  %v109_v57 = vld [vmem:[#allocation8 + $0x88] sm:$0xff] }
  0x75   :  { %627 = vmatprep.subr.bf16.mxu1 %v626_v18  ;;  %v104_v53 = vld [vmem:[#allocation8 + $0x60] sm:$0xff]  ;;  %v106_v56 = vld [vmem:[#allocation8 + $0x70] sm:$0xff]  ;;  %v113_v58 = vld [vmem:[#allocation8 + $0xa8] sm:$0xff] }
  0x76   :  { %v111_v59 = vld [vmem:[#allocation8 + $0x98] sm:$0xff]  ;;  %v640_v61 = vpack.c.bf16 %v104_v53, %v100_v52  ;;  %v656_v62 = vpack.c.bf16 %v106_v56, %v102_v54  ;;  %v642_v63 = vpack.c.bf16 %v113_v58, %v109_v57  ;;  %v108_v1 = vld [vmem:[#allocation8 + $0x80] sm:$0xff]  ;;  %v110_v3 = vld [vmem:[#allocation8 + $0x90] sm:$0xff] }
  0x77   :  { %597 = vmatpush1.bf16.msra.mxu0 %v596_v24  ;;  %v115_v60 = vld [vmem:[#allocation8 + $0xb8] sm:$0xff]  ;;  %v112_v2 = vld [vmem:[#allocation8 + $0xa0] sm:$0xff]  ;;  %v114_v5 = vld [vmem:[#allocation8 + $0xb0] sm:$0xff]  ;;  %v484_v24 = vsub.s32 1, %v479_v21 }
  0x78   :  { %629 = vmatpush1.bf16.msra.mxu1 %v628_v25  ;;  %599 = vmatprep.subr.bf16.mxu0 %v598_v26  ;;  %v658_v4 = vpack.c.bf16 %v115_v60, %v111_v59  ;;  %v117_v6 = vld [vmem:[#allocation8 + $0xc8] sm:$0xff]  ;;  %v119_v8 = vld [vmem:[#allocation8 + $0xd8] sm:$0xff]  ;;  %v644_v10 = vpack.c.bf16 %v112_v2, %v108_v1  ;;  %v660_v11 = vpack.c.bf16 %v114_v5, %v110_v3  ;;  %v116_v13 = vld [vmem:[#allocation8 + $0xc0] sm:$0xff] }
  0x79   :  { %631 = vmatprep.subr.bf16.mxu1 %v630_v30  ;;  %v121_v7 = vld [vmem:[#allocation8 + $0xe8] sm:$0xff]  ;;  %v123_v9 = vld [vmem:[#allocation8 + $0xf8] sm:$0xff]  ;;  %v120_v14 = vld [vmem:[#allocation8 + $0xe0] sm:$0xff] }
  0x7a   :  { %v646_v12 = vpack.c.bf16 %v121_v7, %v117_v6  ;;  %v662_v15 = vpack.c.bf16 %v123_v9, %v119_v8  ;;  %v118_v16 = vld [vmem:[#allocation8 + $0xd0] sm:$0xff]  ;;  %v648_v18 = vpack.c.bf16 %v120_v14, %v116_v13  ;;  %v476_v23 = vld [vmem:[%s1024_s5] sm:$0xf]  ;;  %s868_s5 = smov [#allocation12]  }
  0x7b   :  { %601 = vmatpush1.bf16.msra.mxu0 %v600_v36  ;;  %v122_v17 = vld [vmem:[#allocation8 + $0xf0] sm:$0xff]  ;;  %v481_v25 = vrot.slane %v476_v23, %v480_v22  ;;  %v485_v26 = vrot.slane %v476_v23, %v484_v24  ;;  %v493_v36 = vrot.slane %v476_v23, %v492_v28  ;;  %s550_s23 = sshll.u32 %s868_s5, 4  ;;  %s551_s23 = int_to_ptr.vmem [resolvable:$true] %s550_s23 }
  0x7c   :  { %633 = vmatpush1.bf16.msra.mxu1 %v632_v37  ;;  %635 = vmatprep.subr.bf16.mxu0 %v634_v38  ;;  %v664_v19 = vpack.c.bf16 %v122_v17, %v118_v16  ;;  %v488_v37 = vsub.s32 2, %v479_v21  ;;  %s806_s3 = scalar_lea.vmem %s551_s23, 128  ;;  %p811_p13 = scmp.lt.s32.totalorder %s551_s23, %s551_s23 }
  0x7d   :  { %651 = vmatprep.subr.bf16.mxu1 %v650_v42  ;;  %p807_p12 = scmp.ne.s32.totalorder %s551_s23, %s806_s3  ;;  %p812_p0 = scmp.lt.s32.totalorder %s806_s3, %s806_s3 }
  0x7e   :  { %253 = vmatmul.mubr.f32.vlgmr.msra.gmra.mrb[0].mxu0 %v985_v48  ;;  %v489_v39 = vrot.slane %v476_v23, %v488_v37 }
  0x7f   :  { %324 = vmatmul.mubr.f32.vlgmr.msra.gmra.mrb[0].mxu1 %v985_v48  ;;  %637 = vmatpush1.bf16.msra.mxu0 %v636_v49  ;;  %v90_v49 = vld [vmem:[#allocation7] sm:$0xff]  ;;  %p813_p1 = por %p812_p0, %p811_p13 }
  0x80   :  { %653 = vmatpush1.bf16.msra.mxu1 %v652_v50  ;;  %639 = vmatprep.subr.bf16.mxu0 %v638_v51  ;;  %v530_v56 = vmul.f32 0.1, %v90_v49 }
  0x81   :  { %655 = vmatprep.subr.bf16.mxu1 %v654_v55  ;;  %398 = vmatprep.mubr.f32.mxu0 %v867_v0  ;;  %p814_p2 = pnand %p813_p1, %p807_p12 }
  0x82   :  { %469 = vmatprep.mubr.f32.mxu1 %v867_v0  ;;  %v91_v0 = vld [vmem:[#allocation2] sm:$0xff] }
  0x83   :  { %641 = vmatpush1.bf16.msra.mxu0 %v640_v61 }
  0x84   :  { %657 = vmatpush1.bf16.msra.mxu1 %v656_v62  ;;  %643 = vmatprep.subr.bf16.mxu0 %v642_v63 }
  0x85   :  { %659 = vmatprep.subr.bf16.mxu1 %v658_v4 }
  0x87   :  { %645 = vmatpush1.bf16.msra.mxu0 %v644_v10 }
  0x88   :  { %661 = vmatpush1.bf16.msra.mxu1 %v660_v11  ;;  %647 = vmatprep.subr.bf16.mxu0 %v646_v12 }
  0x89   :  { %663 = vmatprep.subr.bf16.mxu1 %v662_v15 }
  0x8b   :  { %649 = vmatpush1.bf16.msra.mxu0 %v648_v18 }
  0x8c   :  { %665 = vmatpush1.bf16.msra.mxu1 %v664_v19 }
  0x8e   :  { %565 = vmatmul.mubr.msk.f32.vlgmr.msra.gmra.mrb[0].mxu0 %vm330_vm0, %v91_v0 }
  0x8f   :  { %566 = vmatmul.mubr.msk.f32.vlgmr.msra.gmra.mrb[0].mxu1 %vm330_vm0, %v91_v0 }
 0x161   :  { %v400_v27 = vpop.f32.mrb[0].mxu0 }
 0x162   :  { %v498_v29 = vadd.f32 %v481_v25, %v400_v27  ;;  %v471_v30 = vpop.f32.mrb[0].mxu1  ;;  %v402_v31 = vpop.f32.mrb[1].mxu0 }
 0x163   :  { %v499_v32 = vadd.f32 %v485_v26, %v402_v31  ;;  %v473_v33 = vpop.f32.mrb[1].mxu1  ;;  %v500_v41 = vadd.f32 %v489_v39, %v471_v30 }
 0x164   :  { %v567_v34 = vmul.f32 -1.442695, %v498_v29  ;;  %v501_v38 = vadd.f32 %v493_v36, %v473_v33 }
 0x165   :  { %v568_v35 = vmul.f32 -1.442695, %v499_v32 }
 0x166   :  { %680 = vpow2.f32 %v567_v34  ;;  %v569_v40 = vmul.f32 -1.442695, %v501_v38 }
 0x167   :  { %682 = vpow2.f32 %v568_v35 }
 0x168   :  { %684 = vpow2.f32 %v569_v40 }
 0x169   :  { %686 = vtanh.f32 %v500_v41 }
 0x170   :  { %v681_v42 = vpop.eup %680 }
 0x171   :  { %v683_v43 = vpop.eup %682  ;;  %v505_v44 = vadd.f32 1.0, %v681_v42 }
 0x172   :  { %v511_v45 = vadd.f32 1.0, %v683_v43  ;;  %v685_v46 = vpop.eup %684 }
 0x173   :  { %688 = vrcp.f32 %v505_v44  ;;  %v687_v47 = vpop.eup %686  ;;  %v518_v53 = vadd.f32 1.0, %v685_v46 }
 0x174   :  { %690 = vrcp.f32 %v511_v45 }
 0x175   :  { %692 = vrcp.f32 %v518_v53 }
 0x17d   :  { %v689_v50 = vpop.eup %688 }
 0x17e   :  { %v691_v51 = vpop.eup %690  ;;  %v522_v52 = vmul.f32 %v689_v50, %v687_v47 }
 0x17f   :  { %v521_v54 = vmul.f32 %v691_v51, %v90_v49 }
 0x181   :  { %v523_v55 = vadd.f32 %v522_v52, %v521_v54 }
 0x183   :  { %694 = vtanh.f32 %v523_v55  ;;  %v531_v57 = vmul.f32 0.9, %v523_v55 }
 0x185   :  { %v532_v58 = vadd.f32 %v531_v57, %v530_v56 }
 0x187   :  { %533 = vst [vmem:[#allocation12] sm:$0xff] %v532_v58 }
 0x188   :  { %817 = shalt.err (!%p814_p2)
}
 0x189   :  { %s818_s16 = scalar_lea.hbm %s1026_s7, 128 }
 0x18a   :  { %p819_p3 = scmp.ne.s32.totalorder %s1026_s7, %s818_s16  ;;  %p822_p4 = scmp.lt.u32.totalorder %s818_s16, %s1026_s7 }
 0x18c   :  { %p824_p5 = pnand %p822_p4, %p819_p3 }
 0x18e   :  { %827 = shalt.err (!%p824_p5)
}
 0x18f   :  { %553 = dma.vmem_to_hbm [thread:$0]  %s551_s23, 128, %s1026_s7, [#allocation13]   ;;  %v693_v59 = vpop.eup %692  ;;  %v526_v61 = vmul.f32 0.1, %v985_v48 }
 0x190   :  { %v695_v60 = vpop.eup %694  ;;  %s869_s24 = smov [#allocation11]  }
 0x191   :  { %v525_v62 = vmul.f32 %v695_v60, %v693_v59  ;;  %s540_s0 = sshll.u32 %s869_s24, 4  ;;  %s541_s0 = int_to_ptr.vmem [resolvable:$true] %s540_s0 }
 0x192   :  { %s828_s25 = scalar_lea.vmem %s541_s0, 128  ;;  %p833_p7 = scmp.lt.s32.totalorder %s541_s0, %s541_s0 }
 0x193   :  { %v527_v63 = vmul.f32 0.9, %v525_v62  ;;  %p829_p6 = scmp.ne.s32.totalorder %s541_s0, %s828_s25  ;;  %p834_p8 = scmp.lt.s32.totalorder %s828_s25, %s828_s25 }
 0x195   :  { %v528_v1 = vadd.f32 %v527_v63, %v526_v61  ;;  %p835_p9 = por %p834_p8, %p833_p7 }
 0x197   :  { %529 = vst [vmem:[#allocation11] sm:$0xff] %v528_v1  ;;  %p836_p10 = pnand %p835_p9, %p829_p6 }
 0x199   :  { %839 = shalt.err (!%p836_p10)
}
 0x19a   :  { %s840_s28 = scalar_lea.hbm %s1025_s6, 128 }
 0x19b   :  { %p841_p11 = scmp.ne.s32.totalorder %s1025_s6, %s840_s28  ;;  %p844_p12 = scmp.lt.u32.totalorder %s840_s28, %s1025_s6 }
 0x19d   :  { %p846_p13 = pnand %p844_p12, %p841_p11 }
 0x19f   :  { %849 = shalt.err (!%p846_p13)
}
 0x1a0   :  { %543 = dma.vmem_to_hbm [thread:$0]  %s541_s0, 128, %s1025_s6, [#allocation4]  }
 0x1a1   :  { %856 = dma.done.wait [#allocation4], 128  }
 0x1a2   :  { %857 = vsyncadd [#allocation4], 4294967168 }
 0x1a3   :  { %858 = dma.done.wait [#allocation13], 128  }
 0x1a4   :  { %859 = vsyncadd [#allocation13], 4294967168 }
 0x1a5   :  { %560 = vsyncpa [#allocation3], 1 }
 0x1a6   :  { %561 = vsyncpa [#allocation6], 1 }
 0x1a7   :  { %562 = vsyncpa [#allocation9], 1 }
 0x1a8   :  { %563 = vsyncpa [#allocation4], 1 }
 0x1a9   :  { %564 = vsyncpa [#allocation13], 1 }

</bundles_post_ra>
